<compile_context>
chip_gen: v5e
topology: v5e:2x2
jax: 0.10.0
libtpu: 0.0.40
codegen_flags: <defaults>
</compile_context>

<pallas_src>
import functools

import jax
import jax.numpy as jnp
from jax import lax
from jax.experimental import pallas as pl
from jax.experimental.pallas import tpu as pltpu


# ----------------------------------------------------------------------------
# Hardware-aware budgets
# ----------------------------------------------------------------------------

def _hw_budgets():
    """(per-block element budget, vmem_limit_bytes), conservative by default."""
    target_elems = 512 * 1024            # ~2 MiB of f32 work per block (v7x-safe)
    vmem_limit = 32 * 1024 * 1024
    try:
        info = pltpu.get_tpu_info()
        cap = getattr(info, "vmem_capacity_bytes", 0) or 0
        if cap >= 128 * 1024 * 1024:     # v5e / v6e: 128 MiB physical VMEM
            target_elems = 2 * 1024 * 1024   # ~8 MiB f32 blocks
            vmem_limit = 64 * 1024 * 1024
    except Exception:
        pass
    return target_elems, vmem_limit


_TARGET_ELEMS, _VMEM_LIMIT = _hw_budgets()


def _sublane(itemsize):
    if itemsize >= 4:
        return 8
    if itemsize == 2:
        return 16
    return 32


def _choose_tiles(n_rows, n_cols, itemsize, target_elems):
    """Pick (tile_rows, tile_cols): (8,128)-aligned blocks bounded by budget."""
    sub = _sublane(itemsize)
    lane = 128
    if n_rows * n_cols <= target_elems:
        return n_rows, n_cols                      # whole array fits: one block
    # Prefer full-width (lane-dense) rows when a minimum-height block fits.
    if min(sub, n_rows) * n_cols <= target_elems:
        tile_cols = n_cols
    else:
        tile_cols = max(lane, (target_elems // sub) // lane * lane)
        if tile_cols >= n_cols:
            tile_cols = n_cols
    tile_rows = max(sub, (target_elems // max(1, tile_cols)) // sub * sub)
    if tile_rows >= n_rows:
        tile_rows = n_rows
    return tile_rows, tile_cols


# ----------------------------------------------------------------------------
# Kernels
# ----------------------------------------------------------------------------

def _scalar_slot_mask():
    r = lax.broadcasted_iota(jnp.int32, (8, 128), 0)
    c = lax.broadcasted_iota(jnp.int32, (8, 128), 1)
    return jnp.logical_and(r == 0, c == 0)


def _mse_partial_kernel(x_ref, y_ref, o_ref, *, n_rows, n_cols,
                        tile_rows, tile_cols):
    """Partial sum of squared differences over this (row, col) tile."""
    i = pl.program_id(0)
    j = pl.program_id(1)

    x = x_ref[...].astype(jnp.float32)             # (tile_rows, tile_cols)
    y = y_ref[...].astype(jnp.float32)
    d = x - y
    sq = d * d

    pos = _scalar_slot_mask()

    def write(partial):
        o_ref[...] = jnp.where(pos, partial, 0.0)

    row_tail = (n_rows % tile_rows) != 0
    col_tail = (n_cols % tile_cols) != 0

    if not (row_tail or col_tail):
        write(jnp.sum(sq))
    else:
        conds = []
        if row_tail:
            conds.append(i == pl.num_programs(0) - 1)
        if col_tail:
            conds.append(j == pl.num_programs(1) - 1)
        is_edge = conds[0]
        for c in conds[1:]:
            is_edge = jnp.logical_or(is_edge, c)

        @pl.when(is_edge)
        def _():
            valid = None
            if row_tail:
                rid = lax.broadcasted_iota(jnp.int32, sq.shape, 0) + i * tile_rows
                valid = rid < n_rows
            if col_tail:
                cid = lax.broadcasted_iota(jnp.int32, sq.shape, 1) + j * tile_cols
                cv = cid < n_cols
                valid = cv if valid is None else jnp.logical_and(valid, cv)
            # where-select (not multiply): tail garbage (even NaN/Inf) cannot leak.
            write(jnp.sum(jnp.where(valid, sq, 0.0)))

        @pl.when(jnp.logical_not(is_edge))
        def _():
            write(jnp.sum(sq))


def _ce_partial_kernel(logits_ref, tgt_ref, o_ref, *, n_rows, tile_rows):
    """Partial sum of per-row cross-entropy (logsumexp - picked logit)."""
    i = pl.program_id(0)

    logits = logits_ref[...].astype(jnp.float32)   # (tile_rows, K)
    tgt = tgt_ref[...]                             # (tile_rows, 1) int32

    # Numerically stable logsumexp per row (exp/log run on the EUP slot).
    m = jnp.max(logits, axis=1, keepdims=True)
    lse = m + jnp.log(jnp.sum(jnp.exp(logits - m), axis=1, keepdims=True))

    # Target-class logit via iota/one-hot select (no gather op on TPU).
    cls_ids = lax.broadcasted_iota(jnp.int32, logits.shape, 1)
    picked = jnp.sum(jnp.where(cls_ids == tgt, logits, 0.0), axis=1, keepdims=True)

    per_row = lse - picked                         # (tile_rows, 1)

    pos = _scalar_slot_mask()

    def write(partial):
        o_ref[...] = jnp.where(pos, partial, 0.0)

    row_tail = (n_rows % tile_rows) != 0
    if not row_tail:
        write(jnp.sum(per_row))
    else:
        is_edge = i == pl.num_programs(0) - 1

        @pl.when(is_edge)
        def _():
            rid = lax.broadcasted_iota(jnp.int32, per_row.shape, 0) + i * tile_rows
            write(jnp.sum(jnp.where(rid < n_rows, per_row, 0.0)))

        @pl.when(jnp.logical_not(is_edge))
        def _():
            write(jnp.sum(per_row))


# ----------------------------------------------------------------------------
# Wrappers
# ----------------------------------------------------------------------------

def _flatten_for_mse(x):
    """Zero-copy reshape to 2-D with a lane-dense last axis where possible."""
    if x.ndim >= 3:
        lead = 1
        for d in x.shape[:-2]:
            lead *= d
        return x.reshape(lead, x.shape[-2] * x.shape[-1])
    if x.ndim == 2:
        return x
    return x.reshape(1, -1)


def mse_mean(output, target, *, target_elems=_TARGET_ELEMS, vmem_limit=_VMEM_LIMIT):
    """mean((output - target)^2) over all elements, via Pallas."""
    assert output.shape == target.shape
    x2d = _flatten_for_mse(output)
    y2d = _flatten_for_mse(target)
    n_rows, n_cols = x2d.shape
    total = n_rows * n_cols
    itemsize = jnp.dtype(x2d.dtype).itemsize
    tile_rows, tile_cols = _choose_tiles(n_rows, n_cols, itemsize, target_elems)
    num_rt = pl.cdiv(n_rows, tile_rows)
    num_ct = pl.cdiv(n_cols, tile_cols)

    kernel = functools.partial(
        _mse_partial_kernel, n_rows=n_rows, n_cols=n_cols,
        tile_rows=tile_rows, tile_cols=tile_cols)

    partials = pl.pallas_call(
        kernel,
        out_shape=jax.ShapeDtypeStruct((num_rt * 8, num_ct * 128), jnp.float32),
        grid=(num_rt, num_ct),
        in_specs=[
            pl.BlockSpec((tile_rows, tile_cols), lambda i, j: (i, j)),
            pl.BlockSpec((tile_rows, tile_cols), lambda i, j: (i, j)),
        ],
        out_specs=pl.BlockSpec((8, 128), lambda i, j: (i, j)),
        compiler_params=pltpu.CompilerParams(
            dimension_semantics=("parallel", "parallel"),
            vmem_limit_bytes=vmem_limit,
        ),
    )(x2d, y2d)
    return jnp.sum(partials) / jnp.float32(total)


def cross_entropy_mean(logits, targets, *, target_elems=_TARGET_ELEMS,
                       vmem_limit=_VMEM_LIMIT):
    """mean_b[ logsumexp(logits_b) - logits_b[targets_b] ], via Pallas."""
    n_rows, n_cls = logits.shape
    itemsize = jnp.dtype(logits.dtype).itemsize
    sub = _sublane(itemsize)
    # Full class width per block (needed for logsumexp); row-tile to budget.
    tile_rows = max(sub, (target_elems // max(1, n_cls)) // sub * sub)
    if tile_rows >= n_rows:
        tile_rows = n_rows
    num_rt = pl.cdiv(n_rows, tile_rows)

    tgt2d = targets.astype(jnp.int32).reshape(n_rows, 1)
    kernel = functools.partial(_ce_partial_kernel, n_rows=n_rows,
                               tile_rows=tile_rows)

    partials = pl.pallas_call(
        kernel,
        out_shape=jax.ShapeDtypeStruct((num_rt * 8, 128), jnp.float32),
        grid=(num_rt,),
        in_specs=[
            pl.BlockSpec((tile_rows, n_cls), lambda i: (i, 0)),
            pl.BlockSpec((tile_rows, 1), lambda i: (i, 0)),
        ],
        out_specs=pl.BlockSpec((8, 128), lambda i: (i, 0)),
        compiler_params=pltpu.CompilerParams(
            dimension_semantics=("parallel",),
            vmem_limit_bytes=vmem_limit,
        ),
    )(logits, tgt2d)
    return jnp.sum(partials) / jnp.float32(n_rows)


def _joint_loss(output, target, output_m, target_m):
    """JOINTLoss.forward: 0.5 * MSE(output, target) + CE(output_m, target_m)."""
    return 0.5 * mse_mean(output, target) + cross_entropy_mean(output_m, target_m)


# Single jit so both partial-sum reductions and the 0.5*a + b epilogue fuse.
joint_loss = jax.jit(_joint_loss)


# ----------------------------------------------------------------------------
# Reference + self-test
# ----------------------------------------------------------------------------

def _reference(output, target, output_m, target_m):
    mse = jnp.mean((output.astype(jnp.float32) - target.astype(jnp.float32)) ** 2)
    logits = output_m.astype(jnp.float32)
    m = jnp.max(logits, axis=1, keepdims=True)
    lse = (m + jnp.log(jnp.sum(jnp.exp(logits - m), axis=1, keepdims=True)))[:, 0]
    picked = jnp.take_along_axis(
        logits, target_m.astype(jnp.int32)[:, None], axis=1)[:, 0]
    ce = jnp.mean(lse - picked)
    return 0.5 * mse + ce


if __name__ == "__main__":
    key = jax.random.PRNGKey(0)
    k1, k2, k3, k4, k5, k6, k7 = jax.random.split(key, 7)

    # Primary test: shapes consistent with the module's forward.
    B, C, H, W = 2, 4, 16, 16        # regression head (MSE branch)
    Bm, num_classes = 8, 32          # classification head (CE branch)

    output = jax.random.normal(k1, (B, C, H, W), dtype=jnp.float32)
    target = jax.random.normal(k2, (B, C, H, W), dtype=jnp.float32)
    output_m = jax.random.normal(k3, (Bm, num_classes), dtype=jnp.float32)
    target_m = jax.random.randint(k4, (Bm,), 0, num_classes, dtype=jnp.int32)

    loss = joint_loss(output, target, output_m, target_m)
    loss = jax.block_until_ready(loss)
    ref = _reference(output, target, output_m, target_m)
    assert jnp.allclose(loss, ref, atol=1e-5, rtol=1e-5), (loss, ref)

    # Secondary checks: force small tile budgets so the multi-tile grid and
    # ragged-tail masking paths are exercised (still tiny arrays).
    xa = jax.random.normal(k5, (52, 1000), dtype=jnp.float32)
    xb = jax.random.normal(k6, (52, 1000), dtype=jnp.float32)
    got_mse = jax.block_until_ready(
        mse_mean(xa, xb, target_elems=4096, vmem_limit=32 * 1024 * 1024))
    ref_mse = jnp.mean((xa - xb) ** 2)
    assert jnp.allclose(got_mse, ref_mse, atol=1e-5, rtol=1e-5), (got_mse, ref_mse)

    lg = jax.random.normal(k7, (52, 40), dtype=jnp.float32)
    tg = jax.random.randint(k4, (52,), 0, 40, dtype=jnp.int32)
    got_ce = jax.block_until_ready(
        cross_entropy_mean(lg, tg, target_elems=256, vmem_limit=32 * 1024 * 1024))
    m_ = jnp.max(lg, axis=1, keepdims=True)
    lse_ = (m_ + jnp.log(jnp.sum(jnp.exp(lg - m_), axis=1, keepdims=True)))[:, 0]
    pk_ = jnp.take_along_axis(lg, tg[:, None], axis=1)[:, 0]
    ref_ce = jnp.mean(lse_ - pk_)
    assert jnp.allclose(got_ce, ref_ce, atol=1e-5, rtol=1e-5), (got_ce, ref_ce)

    print("KERNEL_OK")
</pallas_src>

<mosaic_0001>
module attributes {stable_mosaic.version = 11 : i64} {
  func.func @_mse_partial_kernel(%arg0: i32, %arg1: i32, %arg2: memref<8x256xf32, #tpu.memory_space<vmem>>, %arg3: memref<8x256xf32, #tpu.memory_space<vmem>>, %arg4: memref<8x128xf32, #tpu.memory_space<vmem>>) attributes {dimension_semantics = [#tpu.dimension_semantics<parallel>, #tpu.dimension_semantics<parallel>], iteration_bounds = array<i64: 1, 1>, scalar_prefetch = 0 : i64, scratch_operands = 0 : i64, tpu.core_type = #tpu.core_type<tc>, window_params = [{transform_indices = @transform_0, window_bounds = array<i64: 8, 256>}, {transform_indices = @transform_1, window_bounds = array<i64: 8, 256>}, {transform_indices = @transform_2, window_bounds = array<i64: 8, 128>}]} {
    %c0 = arith.constant 0 : index
    %c0_0 = arith.constant 0 : index
    %0 = vector.load %arg2[%c0, %c0_0] : memref<8x256xf32, #tpu.memory_space<vmem>>, vector<8x256xf32>
    %c0_1 = arith.constant 0 : index
    %c0_2 = arith.constant 0 : index
    %1 = vector.load %arg3[%c0_1, %c0_2] : memref<8x256xf32, #tpu.memory_space<vmem>>, vector<8x256xf32>
    %2 = arith.subf %0, %1 : vector<8x256xf32>
    %3 = arith.mulf %2, %2 : vector<8x256xf32>
    %4 = tpu.iota {dimensions = array<i32: 0>} : vector<8x128xi32>
    %5 = tpu.iota {dimensions = array<i32: 1>} : vector<8x128xi32>
    %c0_i32 = arith.constant 0 : i32
    %6 = vector.broadcast %c0_i32 : i32 to vector<8x128xi32>
    %7 = arith.cmpi eq, %4, %6 : vector<8x128xi32>
    %c0_i32_3 = arith.constant 0 : i32
    %8 = vector.broadcast %c0_i32_3 : i32 to vector<8x128xi32>
    %9 = arith.cmpi eq, %5, %8 : vector<8x128xi32>
    %10 = arith.andi %7, %9 : vector<8x128xi1>
    %11 = vector.shape_cast %3 : vector<8x256xf32> to vector<1x8x256xf32>
    %cst = arith.constant dense<0.000000e+00> : vector<1xf32>
    %12 = vector.multi_reduction <add>, %11, %cst [1, 2] : vector<1x8x256xf32> to vector<1xf32>
    %13 = vector.shape_cast %12 : vector<1xf32> to vector<1x1x1xf32>
    %14 = vector.extract %13[0, 0, 0] : f32 from vector<1x1x1xf32>
    %cst_4 = arith.constant 0.000000e+00 : f32
    %15 = vector.broadcast %14 : f32 to vector<8x128xf32>
    %16 = vector.broadcast %cst_4 : f32 to vector<8x128xf32>
    %17 = arith.select %10, %15, %16 : vector<8x128xi1>, vector<8x128xf32>
    %c0_5 = arith.constant 0 : index
    %c0_6 = arith.constant 0 : index
    %18 = vector.load %arg4[%c0_5, %c0_6] : memref<8x128xf32, #tpu.memory_space<vmem>>, vector<8x128xf32>
    tpu.vector_store %arg4[%c0_5, %c0_6], %17 {strides = array<i32>} : memref<8x128xf32, #tpu.memory_space<vmem>>, vector<8x128xf32>,
    return
  }
  func.func @transform_0(%arg0: i32, %arg1: i32) -> (i32, i32) {
    %c0_i32 = arith.constant 0 : i32
    return %arg0, %arg1 : i32, i32
  }
  func.func @transform_1(%arg0: i32, %arg1: i32) -> (i32, i32) {
    %c0_i32 = arith.constant 0 : i32
    return %arg0, %arg1 : i32, i32
  }
  func.func @transform_2(%arg0: i32, %arg1: i32) -> (i32, i32) {
    %c0_i32 = arith.constant 0 : i32
    return %arg0, %arg1 : i32, i32
  }
}

module attributes {stable_mosaic.version = 11 : i64} {
  func.func @_ce_partial_kernel(%arg0: i32, %arg1: memref<8x32xf32, #tpu.memory_space<vmem>>, %arg2: memref<8x1xi32, #tpu.memory_space<vmem>>, %arg3: memref<8x128xf32, #tpu.memory_space<vmem>>) attributes {dimension_semantics = [#tpu.dimension_semantics<parallel>], iteration_bounds = array<i64: 1>, scalar_prefetch = 0 : i64, scratch_operands = 0 : i64, tpu.core_type = #tpu.core_type<tc>, window_params = [{transform_indices = @transform_0, window_bounds = array<i64: 8, 32>}, {transform_indices = @transform_1, window_bounds = array<i64: 8, 1>}, {transform_indices = @transform_2, window_bounds = array<i64: 8, 128>}]} {
    %c0 = arith.constant 0 : index
    %c0_0 = arith.constant 0 : index
    %0 = vector.load %arg1[%c0, %c0_0] : memref<8x32xf32, #tpu.memory_space<vmem>>, vector<8x32xf32>
    %c0_1 = arith.constant 0 : index
    %c0_2 = arith.constant 0 : index
    %1 = vector.load %arg2[%c0_1, %c0_2] : memref<8x1xi32, #tpu.memory_space<vmem>>, vector<8x1xi32>
    %cst = arith.constant dense<0xFF800000> : vector<8xf32>
    %2 = vector.multi_reduction <maximumf>, %0, %cst [1] : vector<8x32xf32> to vector<8xf32>
    %3 = vector.shape_cast %2 : vector<8xf32> to vector<8x1xf32>
    %4 = vector.broadcast %3 : vector<8x1xf32> to vector<8x32xf32>
    %5 = arith.subf %0, %4 : vector<8x32xf32>
    %6 = math.exp %5 : vector<8x32xf32>
    %cst_3 = arith.constant dense<0.000000e+00> : vector<8xf32>
    %7 = vector.multi_reduction <add>, %6, %cst_3 [1] : vector<8x32xf32> to vector<8xf32>
    %8 = vector.shape_cast %7 : vector<8xf32> to vector<8x1xf32>
    %9 = math.log %8 : vector<8x1xf32>
    %10 = arith.addf %3, %9 : vector<8x1xf32>
    %11 = tpu.iota {dimensions = array<i32: 1>} : vector<8x32xi32>
    %12 = vector.broadcast %1 : vector<8x1xi32> to vector<8x32xi32>
    %13 = arith.cmpi eq, %11, %12 : vector<8x32xi32>
    %cst_4 = arith.constant 0.000000e+00 : f32
    %14 = vector.broadcast %cst_4 : f32 to vector<8x32xf32>
    %15 = arith.select %13, %0, %14 : vector<8x32xi1>, vector<8x32xf32>
    %cst_5 = arith.constant dense<0.000000e+00> : vector<8xf32>
    %16 = vector.multi_reduction <add>, %15, %cst_5 [1] : vector<8x32xf32> to vector<8xf32>
    %17 = vector.shape_cast %16 : vector<8xf32> to vector<8x1xf32>
    %18 = arith.subf %10, %17 : vector<8x1xf32>
    %19 = tpu.iota {dimensions = array<i32: 0>} : vector<8x128xi32>
    %20 = tpu.iota {dimensions = array<i32: 1>} : vector<8x128xi32>
    %c0_i32 = arith.constant 0 : i32
    %21 = vector.broadcast %c0_i32 : i32 to vector<8x128xi32>
    %22 = arith.cmpi eq, %19, %21 : vector<8x128xi32>
    %c0_i32_6 = arith.constant 0 : i32
    %23 = vector.broadcast %c0_i32_6 : i32 to vector<8x128xi32>
    %24 = arith.cmpi eq, %20, %23 : vector<8x128xi32>
    %25 = arith.andi %22, %24 : vector<8x128xi1>
    %26 = vector.shape_cast %18 : vector<8x1xf32> to vector<1x8x1xf32>
    %cst_7 = arith.constant dense<0.000000e+00> : vector<1xf32>
    %27 = vector.multi_reduction <add>, %26, %cst_7 [1, 2] : vector<1x8x1xf32> to vector<1xf32>
    %28 = vector.shape_cast %27 : vector<1xf32> to vector<1x1x1xf32>
    %29 = vector.extract %28[0, 0, 0] : f32 from vector<1x1x1xf32>
    %cst_8 = arith.constant 0.000000e+00 : f32
    %30 = vector.broadcast %29 : f32 to vector<8x128xf32>
    %31 = vector.broadcast %cst_8 : f32 to vector<8x128xf32>
    %32 = arith.select %25, %30, %31 : vector<8x128xi1>, vector<8x128xf32>
    %c0_9 = arith.constant 0 : index
    %c0_10 = arith.constant 0 : index
    %33 = vector.load %arg3[%c0_9, %c0_10] : memref<8x128xf32, #tpu.memory_space<vmem>>, vector<8x128xf32>
    tpu.vector_store %arg3[%c0_9, %c0_10], %32 {strides = array<i32>} : memref<8x128xf32, #tpu.memory_space<vmem>>, vector<8x128xf32>,
    return
  }
  func.func @transform_0(%arg0: i32) -> (i32, i32) {
    %c0_i32 = arith.constant 0 : i32
    %c0_i32_0 = arith.constant 0 : i32
    return %arg0, %c0_i32 : i32, i32
  }
  func.func @transform_1(%arg0: i32) -> (i32, i32) {
    %c0_i32 = arith.constant 0 : i32
    %c0_i32_0 = arith.constant 0 : i32
    return %arg0, %c0_i32 : i32, i32
  }
  func.func @transform_2(%arg0: i32) -> (i32, i32) {
    %c0_i32 = arith.constant 0 : i32
    %c0_i32_0 = arith.constant 0 : i32
    return %arg0, %c0_i32 : i32, i32
  }
}

</mosaic_0001>

<bundles_post_ra>
// kernel: _joint_loss.2
= control target key start
LH: loop header
LB: loop body
LE: loop exit
PB: predicated region body
PF: predicated region fallthrough
CT: control target
= control target key end

     0   :  { %v19_v16 = vlaneseq  ;;  %s75_s0 = inlined_call_operand.vmem [shape: f32[8,256], index: 0, kind: input, shape index: {}]   ;;  %s76_s1 = inlined_call_operand.vmem [shape: f32[8,256], index: 1, kind: input, shape index: {}]   ;;  %s77_s2 = inlined_call_operand.vmem [shape: f32[8,128], index: 2, kind: output, shape index: {}]  }
   0x1   :  { %v11_v0 = vld [vmem:[%s75_s0] sm:$0xff]  ;;  %v12_v1 = vld [vmem:[%s75_s0 + $0x8] sm:$0xff] }
   0x2   :  { %v13_v2 = vld [vmem:[%s76_s1] sm:$0xff]  ;;  %v14_v3 = vld [vmem:[%s76_s1 + $0x8] sm:$0xff]  ;;  %v20_v17 = vshrl.u32 %v19_v16, 7  ;;  %v22_v18 = vand.u32 127, %v19_v16 }
   0x3   :  { %v15_v4 = vsub.f32 %v11_v0, %v13_v2  ;;  %v16_v5 = vsub.f32 %v12_v1, %v14_v3 }
   0x4   :  { %vm23_vm0 = vcmp.eq.s32.totalorder %v20_v17, 0  ;;  %vm24_vm1 = vcmp.eq.s32.totalorder %v22_v18, 0 }
   0x5   :  { %v17_v6 = vmul.f32 %v15_v4, %v15_v4  ;;  %v18_v7 = vmul.f32 %v16_v5, %v16_v5  ;;  %vm25_vm2 = vmand %vm23_vm0, %vm24_vm1 }
   0x7   :  { %v26_v8 = vadd.f32 %v18_v7, %v17_v6 }
   0x9   :  { %27 = vadd.xlane.f32.xlu0 %v26_v8 }
  0x7c   :  { %v28_v9 = vpop.xlane.xlu0 %27 }
  0x7d   :  { %v29_v10 = vrot.slane %v28_v9, 4 }
  0x7f   :  { %v30_v11 = vadd.f32 %v29_v10, %v28_v9 }
  0x81   :  { %v31_v12 = vrot.slane %v30_v11, 2 }
  0x83   :  { %v32_v13 = vadd.f32 %v31_v12, %v30_v11 }
  0x85   :  { %v33_v14 = vrot.slane %v32_v13, 1 }
  0x87   :  { %v34_v15 = vadd.f32 %v33_v14, %v32_v13 }
  0x89   :  { %43 = vpush %v34_v15 }
  0xba   :  { %s44_s0 = spop %43 }
  0xbb   :  { %v36_v19 = vstv %s44_s0 }
  0xbc   :  { %v37_v20 = vsel %vm25_vm2, %v36_v19, 0.0 }
  0xbd   :  { %38 = vst [vmem:[%s77_s2] sm:$0xff] %v37_v20 }

// kernel: _joint_loss.3
= control target key start
LH: loop header
LB: loop body
LE: loop exit
PB: predicated region body
PF: predicated region fallthrough
CT: control target
= control target key end

     0   :  { %vm13_vm0 = vcmask 261120   ;;  %v68_v1 = vmov 0   ;;  %v26_v9 = vlaneseq  ;;  %vm42_vm2 = vcmask 7168   ;;  %s96_s0 = inlined_call_operand.vmem [shape: f32[8,32], index: 0, kind: input, shape index: {}]   ;;  %s97_s1 = inlined_call_operand.vmem [shape: s32[8,1], index: 1, kind: input, shape index: {}]   ;;  %s98_s2 = inlined_call_operand.vmem [shape: f32[8,128], index: 2, kind: output, shape index: {}]  }
   0x1   :  { %v11_v0 = vld [vmem:[%s96_s0] sm:$0xff]  ;;  %63 = vset.pattern.permute.xlu0 %v68_v1 }
   0x2   :  { %v14_v2 = vsel %vm13_vm0, %v11_v0, -inf  ;;  %v12_v3 = vld [vmem:[%s97_s1] sm:$0xff]  ;;  %v27_v10 = vand.u32 127, %v26_v9  ;;  %v38_v28 = vshrl.u32 %v26_v9, 7 }
   0x3   :  { %15 = vmax.xlane.f32.xlu0 %v14_v2 }
   0x4   :  { %vm39_vm3 = vcmp.eq.s32.totalorder %v38_v28, 0  ;;  %vm40_vm4 = vcmp.eq.s32.totalorder %v27_v10, 0 }
   0x5   :  { %vm41_vm5 = vmand %vm39_vm3, %vm40_vm4 }
  0x17   :  { %29 = vperm.xlu0 %63, %v12_v3  }
  0x76   :  { %v16_v4 = vpop.xlane.xlu0 %15 }
  0x77   :  { %v17_v5 = vsub.f32 %v11_v0, %v16_v4 }
  0x79   :  { %v18_v6 = vmul.f32 1.442695, %v17_v5 }
  0x7b   :  { %64 = vpow2.f32 %v18_v6 }
  0x81   :  { %v65_v7 = vpop.eup %64 }
  0x82   :  { %v20_v8 = vsel %vm13_vm0, %v65_v7, 0.0 }
  0x83   :  { %21 = vadd.xlane.f32.xlu1 %v20_v8 }
  0x89   :  { %v30_v11 = vpop.permute.xlu0 %29 }
  0x8a   :  { %vm31_vm1 = vcmp.eq.s32.totalorder %v27_v10, %v30_v11 }
  0x8b   :  { %v32_v12 = vsel %vm31_vm1, %v11_v0, 0.0 }
  0x8c   :  { %v33_v13 = vsel %vm13_vm0, %v32_v12, 0.0 }
  0x8d   :  { %34 = vadd.xlane.f32.xlu1 %v33_v13 }
  0xf6   :  { %v22_v14 = vpop.xlane.xlu1 %21 }
  0xf7   :  { %66 = vlog2.f32 %v22_v14 }
  0xfd   :  { %v67_v15 = vpop.eup %66 }
  0xfe   :  { %v24_v16 = vmul.f32 0.6931472, %v67_v15 }
 0x100   :  { %v25_v17 = vadd.f32 %v24_v16, %v16_v4  ;;  %v35_v18 = vpop.xlane.xlu1 %34 }
 0x102   :  { %v36_v19 = vsub.f32 %v25_v17, %v35_v18 }
 0x104   :  { %v43_v20 = vsel %vm42_vm2, %v36_v19, 0.0 }
 0x105   :  { %44 = vadd.xlane.f32.xlu2 %v43_v20 }
 0x178   :  { %v45_v21 = vpop.xlane.xlu2 %44 }
 0x179   :  { %v46_v22 = vrot.slane %v45_v21, 4 }
 0x17b   :  { %v47_v23 = vadd.f32 %v46_v22, %v45_v21 }
 0x17d   :  { %v48_v24 = vrot.slane %v47_v23, 2 }
 0x17f   :  { %v49_v25 = vadd.f32 %v48_v24, %v47_v23 }
 0x181   :  { %v50_v26 = vrot.slane %v49_v25, 1 }
 0x183   :  { %v51_v27 = vadd.f32 %v50_v26, %v49_v25 }
 0x185   :  { %60 = vpush %v51_v27 }
 0x1b6   :  { %s61_s0 = spop %60 }
 0x1b7   :  { %v53_v29 = vstv %s61_s0 }
 0x1b8   :  { %v54_v30 = vsel %vm41_vm5, %v53_v29, 0.0 }
 0x1b9   :  { %55 = vst [vmem:[%s98_s2] sm:$0xff] %v54_v30 }

</bundles_post_ra>
